<compile_context>
chip_gen: v5e
topology: v5e:2x2
jax: 0.10.0
libtpu: 0.0.40
codegen_flags: <defaults>
</compile_context>

<pallas_src>
import jax
import jax.numpy as jnp
from jax import lax
from jax.experimental import pallas as pl
from jax.experimental.pallas import tpu as pltpu


_VPU_MAX_CIN = 8      # crossover: Cin <= 8 -> unrolled VPU FMAs, else MXU
_LANE = 128


def _pick_chunk(T):
    """Largest lane chunk (multiple of 128) that divides T; falls back to T."""
    for c in (1024, 512, 256, 128):
        if T % c == 0:
            return c
    return T


def _outconv_kernel(w_ref, b_ref, x_ref, o_ref):
    # w_ref: (Cout, Cin)   1x1 conv weights (resident, tiny)
    # b_ref: (Cout, 1)     bias
    # x_ref: (1, Cin, T)   input strip, spatial positions on the lane axis
    # o_ref: (1, Cout, T)  output strip (lane-dense, 128-aligned store)
    Cout, Cin = w_ref.shape
    T = o_ref.shape[2]

    if Cin > _VPU_MAX_CIN:
        # ---- MXU path: one contraction, f32 accumulation -------------------
        # No upcast of the activations: bf16 feeds the MXU natively on
        # v6e/v7x; accumulation is f32 via preferred_element_type.
        x = x_ref[0]                                      # (Cin, T)
        w = w_ref[...]
        if w.dtype != x.dtype:
            w = w.astype(x.dtype)                         # weights are tiny
        y = jnp.dot(w, x, preferred_element_type=jnp.float32)
        y = y + b_ref[...].astype(jnp.float32)            # (Cout,1) over lanes
        o_ref[0] = y.astype(o_ref.dtype)
        return

    # ---- Small-Cin path: Cin-unrolled VPU FMAs over register-sized chunks --
    chunk = _pick_chunk(T)
    n_chunks = T // chunk

    w_f32 = w_ref[...].astype(jnp.float32)                # (Cout, Cin)
    b_f32 = b_ref[...].astype(jnp.float32)                # (Cout, 1)
    # Hoist every broadcast out of the chunk loop (JAX does not CSE
    # broadcast_in_dim): one (Cout, chunk) plane per input channel + bias.
    bias_bc = jnp.broadcast_to(b_f32, (Cout, chunk))
    w_bc = [jnp.broadcast_to(w_f32[:, ci:ci + 1], (Cout, chunk))
            for ci in range(Cin)]

    def do_chunk(off):
        xc = x_ref[0, :, pl.ds(off, chunk)].astype(jnp.float32)  # (Cin, chunk)
        acc = bias_bc
        for ci in range(Cin):
            x_row = jnp.broadcast_to(xc[ci][None, :], (Cout, chunk))
            acc = acc + w_bc[ci] * x_row
        o_ref[0, :, pl.ds(off, chunk)] = acc.astype(o_ref.dtype)

    if n_chunks == 1:
        do_chunk(0)
    else:
        def body(c, carry):
            do_chunk(pl.multiple_of(c * chunk, _LANE))
            return carry
        lax.fori_loop(0, n_chunks, body, 0)


def _choose_strip(HW, N, Cin, Cout, itemsize):
    """Spatial strip length per grid step.

    Target ~4 MiB of HBM traffic (input + output) per step so the fixed
    ~0.35 us grid-step overhead is amortized on v5e/v6e/v7x, while keeping
    double-buffered blocks small relative to v7x's 64 MiB VMEM."""
    target_step_bytes = 4 << 20
    per_pos_bytes = (Cin + Cout) * itemsize
    ts = target_step_bytes // per_pos_bytes
    if ts >= 1024:
        ts = (ts // 1024) * 1024            # clean 1024-multiples -> clean chunks
    else:
        ts = max(_LANE, (ts // _LANE) * _LANE)
    if HW <= ts:
        ts = HW                             # full dim: (8,128) rule satisfied
    # Megacore (v7x): keep >= 2 grid steps whenever the problem allows it.
    if N * ((HW + ts - 1) // ts) < 2 and HW >= 2 * _LANE:
        ts = max(_LANE, ((HW // 2) // _LANE) * _LANE)
    return int(ts)


def out_conv(x_nchw, w, b):
    """1x1 convolution matching nn.Conv2d(in_channels, out_channels, kernel_size=1).

    x_nchw: (N, Cin, H, W), w: (Cout, Cin, 1, 1), b: (Cout,) -> (N, Cout, H, W)."""
    N, Cin, H, W = x_nchw.shape
    Cout = w.shape[0]
    HW = H * W
    itemsize = jnp.dtype(x_nchw.dtype).itemsize

    # Free re-views (no data movement): NCHW is already (N, C, H*W) in memory.
    x_flat = x_nchw.reshape(N, Cin, HW)
    w2 = w[:, :, 0, 0]                      # (Cout, Cin)
    b2 = b.reshape(Cout, 1)                 # (Cout, 1)

    TS = _choose_strip(HW, N, Cin, Cout, itemsize)
    grid = (N, pl.cdiv(HW, TS))

    # VMEM budget: double-buffered in/out strips + f32 temporaries, with 2x
    # headroom; clamp to [32 MiB, 48 MiB] (safe on v7x's 64 MiB physical VMEM,
    # above the 16/32 MiB scoped defaults on v5e/v6e).
    step_bytes = (Cin + Cout) * TS * itemsize
    vmem_need = 2 * step_bytes + (Cin + Cout) * TS * 4
    vmem_limit = int(min(max(2 * vmem_need, 32 << 20), 48 << 20))

    cost = pl.CostEstimate(
        flops=2 * N * HW * Cin * Cout,
        transcendentals=0,
        bytes_accessed=N * HW * (Cin + Cout) * itemsize,
    )

    out_flat = pl.pallas_call(
        _outconv_kernel,
        out_shape=jax.ShapeDtypeStruct((N, Cout, HW), x_nchw.dtype),
        grid_spec=pltpu.PrefetchScalarGridSpec(
            num_scalar_prefetch=0,
            grid=grid,
            in_specs=[
                pl.BlockSpec((Cout, Cin), lambda n, s: (0, 0)),      # weights (resident)
                pl.BlockSpec((Cout, 1), lambda n, s: (0, 0)),        # bias (resident)
                pl.BlockSpec((1, Cin, TS), lambda n, s: (n, 0, s)),  # input strip
            ],
            out_specs=pl.BlockSpec((1, Cout, TS), lambda n, s: (n, 0, s)),
        ),
        compiler_params=pltpu.CompilerParams(
            dimension_semantics=("parallel", "parallel"),
            vmem_limit_bytes=vmem_limit,
        ),
        cost_estimate=cost,
    )(w2, b2, x_flat)

    # Free reshape back to NCHW (same memory order) to match nn.Conv2d output.
    return out_flat.reshape(N, Cout, H, W)


def _reference(x_nchw, w, b):
    Cout = w.shape[0]
    y = jax.lax.conv_general_dilated(
        x_nchw, w, window_strides=(1, 1), padding=((0, 0), (0, 0)),
        dimension_numbers=("NCHW", "OIHW", "NCHW"))
    return y + b.reshape(1, Cout, 1, 1)


if __name__ == "__main__":
    N, Cin, Cout, H, W = 2, 4, 8, 16, 16

    key = jax.random.PRNGKey(0)
    kx, kw, kb = jax.random.split(key, 3)

    x = jax.random.normal(kx, (N, Cin, H, W), dtype=jnp.float32)
    w = jax.random.normal(kw, (Cout, Cin, 1, 1), dtype=jnp.float32) * 0.1
    b = jax.random.normal(kb, (Cout,), dtype=jnp.float32) * 0.1

    out = jax.block_until_ready(out_conv(x, w, b))
    ref = jax.block_until_ready(_reference(x, w, b))

    assert out.shape == (N, Cout, H, W)
    assert jnp.allclose(out, ref, atol=1e-4, rtol=1e-4)

    print("KERNEL_OK")
</pallas_src>

<mosaic_0001>
module attributes {stable_mosaic.version = 11 : i64} {
  func.func @_outconv_kernel(%arg0: i32, %arg1: i32, %arg2: memref<8x4xf32, #tpu.memory_space<vmem>>, %arg3: memref<8x1xf32, #tpu.memory_space<vmem>>, %arg4: memref<1x4x256xf32, #tpu.memory_space<vmem>>, %arg5: memref<1x8x256xf32, #tpu.memory_space<vmem>>) attributes {dimension_semantics = [#tpu.dimension_semantics<parallel>, #tpu.dimension_semantics<parallel>], iteration_bounds = array<i64: 2, 1>, scalar_prefetch = 0 : i64, scratch_operands = 0 : i64, tpu.core_type = #tpu.core_type<tc>, window_params = [{pipeline_mode = #tpu.pipeline_mode<synchronous>, transform_indices = @transform_0, window_bounds = array<i64: 8, 4>}, {pipeline_mode = #tpu.pipeline_mode<synchronous>, transform_indices = @transform_1, window_bounds = array<i64: 8, 1>}, {transform_indices = @transform_2, window_bounds = array<i64: 1, 4, 256>}, {transform_indices = @transform_3, window_bounds = array<i64: 1, 8, 256>}]} {
    %c0 = arith.constant 0 : index
    %c0_0 = arith.constant 0 : index
    %0 = vector.load %arg2[%c0, %c0_0] : memref<8x4xf32, #tpu.memory_space<vmem>>, vector<8x4xf32>
    %c0_1 = arith.constant 0 : index
    %c0_2 = arith.constant 0 : index
    %1 = vector.load %arg3[%c0_1, %c0_2] : memref<8x1xf32, #tpu.memory_space<vmem>>, vector<8x1xf32>
    %2 = vector.shape_cast %1 : vector<8x1xf32> to vector<8x1xf32>
    %3 = vector.broadcast %2 : vector<8x1xf32> to vector<8x256xf32>
    %4 = vector.extract_strided_slice %0 {offsets = [0, 0], sizes = [8, 1], strides = [1, 1]} : vector<8x4xf32> to vector<8x1xf32>
    %5 = vector.shape_cast %4 : vector<8x1xf32> to vector<8x1xf32>
    %6 = vector.broadcast %5 : vector<8x1xf32> to vector<8x256xf32>
    %7 = vector.extract_strided_slice %0 {offsets = [0, 1], sizes = [8, 1], strides = [1, 1]} : vector<8x4xf32> to vector<8x1xf32>
    %8 = vector.shape_cast %7 : vector<8x1xf32> to vector<8x1xf32>
    %9 = vector.broadcast %8 : vector<8x1xf32> to vector<8x256xf32>
    %10 = vector.extract_strided_slice %0 {offsets = [0, 2], sizes = [8, 1], strides = [1, 1]} : vector<8x4xf32> to vector<8x1xf32>
    %11 = vector.shape_cast %10 : vector<8x1xf32> to vector<8x1xf32>
    %12 = vector.broadcast %11 : vector<8x1xf32> to vector<8x256xf32>
    %13 = vector.extract_strided_slice %0 {offsets = [0, 3], sizes = [8, 1], strides = [1, 1]} : vector<8x4xf32> to vector<8x1xf32>
    %14 = vector.shape_cast %13 : vector<8x1xf32> to vector<8x1xf32>
    %15 = vector.broadcast %14 : vector<8x1xf32> to vector<8x256xf32>
    %c0_3 = arith.constant 0 : index
    %c0_4 = arith.constant 0 : index
    %c0_5 = arith.constant 0 : index
    %16 = vector.load %arg4[%c0_3, %c0_4, %c0_5] : memref<1x4x256xf32, #tpu.memory_space<vmem>>, vector<1x4x256xf32>
    %17 = vector.shape_cast %16 : vector<1x4x256xf32> to vector<4x256xf32>
    %18 = vector.extract_strided_slice %17 {offsets = [0, 0], sizes = [1, 256], strides = [1, 1]} : vector<4x256xf32> to vector<1x256xf32>
    %19 = vector.shape_cast %18 : vector<1x256xf32> to vector<256xf32>
    %20 = vector.shape_cast %19 : vector<256xf32> to vector<1x256xf32>
    %21 = vector.shape_cast %20 : vector<1x256xf32> to vector<1x256xf32>
    %22 = vector.broadcast %21 : vector<1x256xf32> to vector<8x256xf32>
    %23 = arith.mulf %6, %22 : vector<8x256xf32>
    %24 = arith.addf %3, %23 : vector<8x256xf32>
    %25 = vector.extract_strided_slice %17 {offsets = [1, 0], sizes = [1, 256], strides = [1, 1]} : vector<4x256xf32> to vector<1x256xf32>
    %26 = vector.shape_cast %25 : vector<1x256xf32> to vector<256xf32>
    %27 = vector.shape_cast %26 : vector<256xf32> to vector<1x256xf32>
    %28 = vector.shape_cast %27 : vector<1x256xf32> to vector<1x256xf32>
    %29 = vector.broadcast %28 : vector<1x256xf32> to vector<8x256xf32>
    %30 = arith.mulf %9, %29 : vector<8x256xf32>
    %31 = arith.addf %24, %30 : vector<8x256xf32>
    %32 = vector.extract_strided_slice %17 {offsets = [2, 0], sizes = [1, 256], strides = [1, 1]} : vector<4x256xf32> to vector<1x256xf32>
    %33 = vector.shape_cast %32 : vector<1x256xf32> to vector<256xf32>
    %34 = vector.shape_cast %33 : vector<256xf32> to vector<1x256xf32>
    %35 = vector.shape_cast %34 : vector<1x256xf32> to vector<1x256xf32>
    %36 = vector.broadcast %35 : vector<1x256xf32> to vector<8x256xf32>
    %37 = arith.mulf %12, %36 : vector<8x256xf32>
    %38 = arith.addf %31, %37 : vector<8x256xf32>
    %39 = vector.extract_strided_slice %17 {offsets = [3, 0], sizes = [1, 256], strides = [1, 1]} : vector<4x256xf32> to vector<1x256xf32>
    %40 = vector.shape_cast %39 : vector<1x256xf32> to vector<256xf32>
    %41 = vector.shape_cast %40 : vector<256xf32> to vector<1x256xf32>
    %42 = vector.shape_cast %41 : vector<1x256xf32> to vector<1x256xf32>
    %43 = vector.broadcast %42 : vector<1x256xf32> to vector<8x256xf32>
    %44 = arith.mulf %15, %43 : vector<8x256xf32>
    %45 = arith.addf %38, %44 : vector<8x256xf32>
    %c0_6 = arith.constant 0 : index
    %c0_7 = arith.constant 0 : index
    %c0_8 = arith.constant 0 : index
    %46 = vector.load %arg5[%c0_6, %c0_7, %c0_8] : memref<1x8x256xf32, #tpu.memory_space<vmem>>, vector<1x8x256xf32>
    %47 = vector.shape_cast %46 : vector<1x8x256xf32> to vector<8x256xf32>
    %48 = vector.shape_cast %45 : vector<8x256xf32> to vector<1x8x256xf32>
    tpu.vector_store %arg5[%c0_6, %c0_7, %c0_8], %48 {strides = array<i32>} : memref<1x8x256xf32, #tpu.memory_space<vmem>>, vector<1x8x256xf32>,
    return
  }
  func.func @transform_0(%arg0: i32, %arg1: i32) -> (i32, i32) {
    %c0_i32 = arith.constant 0 : i32
    %c0_i32_0 = arith.constant 0 : i32
    %c0_i32_1 = arith.constant 0 : i32
    return %c0_i32, %c0_i32_0 : i32, i32
  }
  func.func @transform_1(%arg0: i32, %arg1: i32) -> (i32, i32) {
    %c0_i32 = arith.constant 0 : i32
    %c0_i32_0 = arith.constant 0 : i32
    %c0_i32_1 = arith.constant 0 : i32
    return %c0_i32, %c0_i32_0 : i32, i32
  }
  func.func @transform_2(%arg0: i32, %arg1: i32) -> (i32, i32, i32) {
    %c0_i32 = arith.constant 0 : i32
    %c0_i32_0 = arith.constant 0 : i32
    return %arg0, %c0_i32, %arg1 : i32, i32, i32
  }
  func.func @transform_3(%arg0: i32, %arg1: i32) -> (i32, i32, i32) {
    %c0_i32 = arith.constant 0 : i32
    %c0_i32_0 = arith.constant 0 : i32
    return %arg0, %c0_i32, %arg1 : i32, i32, i32
  }
}

</mosaic_0001>

<bundles_post_ra>
// kernel: tpu_custom_call.1
= control target key start
LH: loop header
LB: loop body
LE: loop exit
PB: predicated region body
PF: predicated region fallthrough
CT: control target
= control target key end

     0   :  { %8 = vsyncpa [#allocation3], 0  ;;  %s653_s0 = inlined_call_operand.vmem [shape: f32[8,4], index: 0, kind: input, shape index: {}]   ;;  %s654_s1 = inlined_call_operand.vmem [shape: f32[8,1], index: 1, kind: input, shape index: {}]   ;;  %s655_s2 = inlined_call_operand.vmem [shape: f32[2,4,256], index: 2, kind: input, shape index: {}]   ;;  %s656_s3 = inlined_call_operand.hbm [shape: f32[2,8,256], index: 3, kind: output, shape index: {}]  }
   0x1   :  { %10 = vsyncpa [#allocation3 + $0x1], 0  ;;  %s546_s12 = smov 0   ;;  %s548_s13 = smov 0  }
   0x2   :  { %s550_s14 = smov 0   ;;  %s552_s15 = smov 0  }
   0x3   :  { %s554_s16 = smov 0   ;;  %s556_s17 = smov 0  }
   0x4 LB: > { %s363_s18 = sadd.s32 4294967295, %s520_s17   ;;  %s364_s19 = sadd.s32 4294967294, %s520_s17   ;;  %s520_s17 = sphi %s556_s17, %s16_s17   ;;  %s516_s16 = sphi %s554_s16, %s663_s16   ;;  %s512_s15 = sphi %s552_s15, %s662_s15   ;;  %s508_s14 = sphi %s550_s14, %s661_s14   ;;  %s504_s13 = sphi %s548_s13, %s660_s13   ;;  %s500_s12 = sphi %s546_s12, %s659_s12  }
   0x5   : > { %s28_s20 = sadd.s32 1, %s516_s16  ;;  %s107_s21 = sadd.s32 1, %s508_s14 }
   0x6   : > { %p30_p0 = scmp.ge.s32.totalorder %s28_s20, 2  ;;  %p117_p1 = scmp.ne.s32.totalorder %s508_s14, %s504_s13 }
   0x7   : > { %p118_p2 = scmp.eq.s32.totalorder %s363_s18, 1  ;;  %p123_p3 = scmp.ne.s32.totalorder %s504_s13, %s500_s12 }
   0x8   : > { %s665_s20 = smov (%p30_p0, %s28_s20), 0  ;;  %p124_p5 = scmp.eq.s32.totalorder %s364_s19, 1 }
   0x9   : > { %p586_p4 = por %p118_p2, %p117_p1  ;;  %s102_s23 = ssub.s32 %s516_s16, %s665_s20 }
   0xa   : > { %p367_p6 = scmp.ge.s32.totalorder %s520_s17, 1  ;;  %p105_p7 = scmp.eq.s32.totalorder %s102_s23, 0 }
   0xb   : > { %p593_p8 = por %p124_p5, %p123_p3  ;;  %p161_p9 = scmp.lt.s32.totalorder %s520_s17, 3 }
   0xc   : > { %s599_s25 = scalar_select %p105_p7, %s508_s14, %s107_s21  }
   0xd   : > { %p162_p10 = pnand %p367_p6, %p161_p9 }
   0xe   : > { %p190_p11 = scmp.lt.s32.totalorder (!%p162_p10), %s512_s15, 1  ;;  %s186_s8 = sand.u32 (!%p162_p10), 1, %s504_s13  }
   0xf   : > { %165 = sbr.rel (%p162_p10) target bundleno = 157 (0x9d), region = 32  ;;  %s368_s9 = sshll.u32 (!%p162_p10), %s186_s8, 4 }
  0x10   : > { %s377_s10 = sshll.u32 (!%p162_p10), %s512_s15, 4  ;;  %s269_s26 = scalar_lea.sflag (!%p162_p10), [#allocation3], %s186_s8 }
  0x11   : > { %s282_s19 = scalar_lea.hbm (!%p162_p10), %s656_s3, %s377_s10 }
  0x12   : > { %s286_s23 = sshll.u32 (!%p162_p10), %s282_s19, 4  ;;  %s287_s23 = int_to_ptr.hbm [resolvable:$true] %s286_s23 }
  0x13   : > { %s456_s27 = sshra.s32 (!%p162_p10), %s287_s23, 4  ;;  %s457_s27 = int_to_ptr.hbm [resolvable:$true] %s456_s27 }
  0x14   : > { %v200_v0 = vld [vmem:[%s653_s0] sm:$0xff]  ;;  %v522_v1 = vmov 0   ;;  %v523_v2 = vmov 1   ;;  %v524_v3 = vmov 3   ;;  %v525_v5 = vmov 2   ;;  %s191_s30 = scalar_select %p190_p11, %s512_s15, 1 }
  0x15   : > { %437 = vset.pattern.permute.xlu0 %v522_v1  ;;  %438 = vset.pattern.permute.xlu1 %v523_v2  ;;  %v201_v4 = vld [vmem:[%s654_s1] sm:$0xff]  ;;  %s188_s15 = scalar_lea.vmem [#allocation2], %s368_s9  ;;  %s458_s28 = scalar_lea.hbm %s457_s27, 16 }
  0x16   : > { %209 = vperm.xlu0 %437, %v200_v0   ;;  %213 = vperm.xlu1 %438, %v200_v0   ;;  %s376_s4 = sshll.u32 %s191_s30, 3  ;;  %s284_s21 = sshll.u32 %s188_s15, 4  ;;  %s285_s21 = int_to_ptr.vmem [resolvable:$true] %s284_s21 }
  0x17   : > { %440 = vset.pattern.permute.xlu2 %v524_v3  ;;  %s197_s7 = scalar_lea.vmem %s655_s2, %s376_s4  ;;  %p459_p12 = scmp.ne.s32.totalorder %s457_s27, %s458_s28 }
  0x18   : > { %221 = vperm.xlu2 %440, %v200_v0   ;;  %v224_v6 = vld [vmem:[%s197_s7] sm:$0xff]  ;;  %s462_s4 = scalar_lea.hbm %s656_s3, 32  ;;  %p463_p1 = scmp.lt.s32.totalorder %s457_s27, %s656_s3 }
  0x19   : > { %v226_v7 = vperm.slane %v224_v6, 0  ;;  %v227_v8 = vperm.slane %v224_v6, 4  ;;  %v236_v11 = vperm.slane %v224_v6, 1  ;;  %v237_v12 = vperm.slane %v224_v6, 5  ;;  %p460_p13 = pnand %p459_p12, %p586_p4  ;;  %p464_p2 = scmp.lt.s32.totalorder %s462_s4, %s458_s28 }
  0x1a   : > { %v246_v13 = vperm.slane %v224_v6, 2  ;;  %v247_v14 = vperm.slane %v224_v6, 6  ;;  %v256_v17 = vperm.slane %v224_v6, 3  ;;  %v257_v18 = vperm.slane %v224_v6, 7 }
  0x1b   : > { %v230_v15 = vperm.slane %v226_v7, 0  ;;  %v231_v16 = vperm.slane %v227_v8, 0  ;;  %v240_v19 = vperm.slane %v236_v11, 1  ;;  %v241_v20 = vperm.slane %v237_v12, 1  ;;  %p461_p0 = pneg %p460_p13  ;;  %p465_p3 = por %p464_p2, %p463_p1 }
  0x1c   : > { %v250_v21 = vperm.slane %v246_v13, 2  ;;  %v251_v22 = vperm.slane %v247_v14, 2  ;;  %v260_v25 = vperm.slane %v256_v17, 3  ;;  %v261_v26 = vperm.slane %v257_v18, 3 }
  0x1d   : > { %p466_p5 = pnand %p465_p3, %p461_p0 }
  0x1e   : > { %204 = vperm.xlu0 %437, %v201_v4   ;;  %439 = vset.pattern.permute.xlu1 %v525_v5 }
  0x1f   : > { %217 = vperm.xlu1 %439, %v200_v0  }
  0x26   : > { %441 = vset.pattern.permute.xlu0 %v524_v3 }
  0x72   : > { %v222_v28 = vpop.permute.xlu2 %221 }
  0x73   : > { %v262_v38 = vmul.f32 %v260_v25, %v222_v28  ;;  %v263_v39 = vmul.f32 %v261_v26, %v222_v28 }
  0x88   : > { %v210_v9 = vpop.permute.xlu0 %209  ;;  %v214_v10 = vpop.permute.xlu1 %213 }
  0x89   : > { %v232_v23 = vmul.f32 %v230_v15, %v210_v9  ;;  %v233_v24 = vmul.f32 %v231_v16, %v210_v9  ;;  %v242_v29 = vmul.f32 %v240_v19, %v214_v10  ;;  %v243_v30 = vmul.f32 %v241_v20, %v214_v10 }
  0x90   : > { %v205_v27 = vpop.permute.xlu0 %204 }
  0x91   : > { %v234_v31 = vadd.f32 %v232_v23, %v205_v27  ;;  %v235_v32 = vadd.f32 %v233_v24, %v205_v27  ;;  %v218_v33 = vpop.permute.xlu1 %217 }
  0x92   : > { %v252_v34 = vmul.f32 %v250_v21, %v218_v33  ;;  %v253_v35 = vmul.f32 %v251_v22, %v218_v33 }
  0x93   : > { %v244_v36 = vadd.f32 %v242_v29, %v234_v31  ;;  %v245_v37 = vadd.f32 %v243_v30, %v235_v32 }
  0x95   : > { %v254_v40 = vadd.f32 %v252_v34, %v244_v36  ;;  %v255_v41 = vadd.f32 %v253_v35, %v245_v37 }
  0x97   : > { %v264_v42 = vadd.f32 %v262_v38, %v254_v40  ;;  %v265_v43 = vadd.f32 %v263_v39, %v255_v41 }
  0x99   : > { %266 = vst [vmem:[%s188_s15] sm:$0xff] %v264_v42 }
  0x9a   : > { %267 = vst [vmem:[%s188_s15 + $0x8] sm:$0xff] %v265_v43 }
  0x9b   : > { %469 = shalt.err (!%p466_p5)
}
  0x9c   : > { %378 = dma.vmem_to_hbm [thread:$0]  (%p586_p4), %s285_s21, 256, %s287_s23, %s269_s26  }
  0x9d PF: > { %p384_p6 = scmp.ge.s32.totalorder %s520_s17, 2  ;;  %s298_s7 = sand.u32 1, %s500_s12  }
  0x9e   : > { %s299_s8 = scalar_lea.sflag [#allocation3], %s298_s7 }
  0x9f   : > { %p381_p7 = pnand %p384_p6, %p593_p8 }
  0xa1   : > { %p382_p9 = pneg %p381_p7 }
  0xa3   : > { %495 = dma.done.wait (%p382_p9), %s299_s8, 256  }
  0xa4   : > { %497 = vsyncadd (%p382_p9), %s299_s8, 4294967040  ;;  %s16_s17 = sadd.s32 1, %s520_s17   ;;  %s659_s12 = smov %s504_s13 }
  0xa5   : > { %p13_p10 = scmp.ge.s32.totalorder %s16_s17, 4   ;;  %s660_s13 = smov %s508_s14 }
  0xa6   : > { %s661_s14 = smov %s599_s25  ;;  %s662_s15 = smov %s516_s16 }
  0xa7   : > { %s663_s16 = smov %s665_s20  ;;  %15 = sbr.rel (!%p13_p10) target bundleno = 4 (0x4), region = 67 }
  0xac   :  { %305 = vsyncpa [#allocation3], 1 }
  0xad   :  { %307 = vsyncpa [#allocation3 + $0x1], 1 }

</bundles_post_ra>
